<compile_context>
chip_gen: v7x
topology: tpu7x:2x2x1
jax: 0.10.0
libtpu: 0.0.40
codegen_flags: <defaults>
</compile_context>

<pallas_src>
import jax
import jax.numpy as jnp
from jax.experimental import pallas as pl
from jax.experimental.pallas import tpu as pltpu


def _round_up(x, m):
    return (x + m - 1) // m * m


def _sigmoid(z):
    # Single-EUP sigmoid; exact 0.5 at z == 0 (required by the zero-padding scheme).
    return 0.5 * jnp.tanh(0.5 * z) + 0.5


def _mlp_kernel(x_ref, w1_ref, b1_ref, w2_ref, b2_ref, w3_ref, b3_ref, o_ref):
    # x arrives unpadded f32; cast to bf16 in-kernel (no extra HBM pass).
    x = x_ref[...].astype(jnp.bfloat16)
    # Layer 1: (tb, 153) @ (153, H1p) on the MXU, f32 accumulation.
    h1 = jnp.dot(x, w1_ref[...], preferred_element_type=jnp.float32)
    h1 = _sigmoid(h1 + b1_ref[...])
    # Layer 2: (tb, H1p) @ (H1p, H2p); padded rows of w2 are zero -> padded 0.5
    # activations contribute nothing.
    h2 = jnp.dot(h1.astype(jnp.bfloat16), w2_ref[...],
                 preferred_element_type=jnp.float32)
    h2 = _sigmoid(h2 + b2_ref[...])
    # Output layer: (tb, H2p) @ (H2p, OUTp); lane-dense f32 store.
    o = jnp.dot(h2.astype(jnp.bfloat16), w3_ref[...],
                preferred_element_type=jnp.float32)
    o_ref[...] = _sigmoid(o + b3_ref[...]).astype(o_ref.dtype)


def _pad2(a, rows, cols):
    return jnp.pad(a, ((0, rows - a.shape[0]), (0, cols - a.shape[1])))


def prepare_params(w1, b1, w2, b2, w3, b3):
    """One-time parameter prep: lane-pad feature dims (zeros), cast weights to bf16.

    Weights are stored as (in, out); biases as (1, out) — i.e. x @ W + b, which
    matches torch's x @ W.T + b with W.T pre-materialized.
    """
    in_dim, h1 = w1.shape
    h1b, h2 = w2.shape
    h2b, out_dim = w3.shape
    assert h1b == h1 and h2b == h2
    h1_p, h2_p, out_p = (_round_up(d, 128) for d in (h1, h2, out_dim))
    return {
        # w1 keeps its true 153 contraction rows (full-dim block is legal);
        # only output columns are lane-padded. w2/w3 also zero-pad the rows
        # matching the padded hidden columns so the spurious 0.5s cancel.
        "w1": _pad2(w1, in_dim, h1_p).astype(jnp.bfloat16),
        "b1": _pad2(b1.reshape(1, -1), 1, h1_p).astype(jnp.float32),
        "w2": _pad2(w2, h1_p, h2_p).astype(jnp.bfloat16),
        "b2": _pad2(b2.reshape(1, -1), 1, h2_p).astype(jnp.float32),
        "w3": _pad2(w3, h2_p, out_p).astype(jnp.bfloat16),
        "b3": _pad2(b3.reshape(1, -1), 1, out_p).astype(jnp.float32),
        "dims": (in_dim, h1, h2, out_dim),  # true (unpadded) dims
    }


def mlp_forward(x, params, *, block_batch=2048):
    """3-layer MLP forward (x @ W + b, sigmoid each layer) as one Pallas kernel."""
    batch, in_dim = x.shape
    in_dim_p, h1, h2, out_dim = params["dims"]
    assert in_dim == in_dim_p, (in_dim, in_dim_p)
    w1, b1 = params["w1"], params["b1"]
    w2, b2 = params["w2"], params["b2"]
    w3, b3 = params["w3"], params["b3"]
    h1_p, h2_p, out_p = w1.shape[1], w2.shape[1], w3.shape[1]

    # Batch tile: multiple of 16 rows (bf16 sublane packing), and at most half
    # the batch so large batches give >= 2 tiles (both v7x TCs get work).
    tb = min(block_batch, max(16, _round_up(pl.cdiv(batch, 2), 16)))
    grid = (pl.cdiv(batch, tb),)  # last tile may be partial; OOB writes are masked

    def resident(shape):
        # Weights / biases: same block every grid step -> stay VMEM-resident.
        return pl.BlockSpec(shape, lambda i: (0, 0))

    # Advisory cost estimate with REAL (unpadded) dims.
    flops = 2 * batch * (in_dim * h1 + h1 * h2 + h2 * out_dim)
    transcendentals = batch * (h1 + h2 + out_dim)
    bytes_accessed = (
        x.size * x.dtype.itemsize
        + (w1.size + w2.size + w3.size) * 2       # bf16 weights
        + (b1.size + b2.size + b3.size) * 4       # f32 biases
        + batch * out_p * 4                        # f32 output
    )

    # VMEM budget from the actual footprint (x2 headroom), capped at v7x's 64 MiB.
    weight_bytes = (w1.size + w2.size + w3.size) * 2 + (b1.size + b2.size + b3.size) * 4
    tile_bytes = 2 * tb * in_dim * 4 + 2 * tb * out_p * 4      # double-buffered x / out
    interm_bytes = 3 * tb * max(h1_p, h2_p, out_p) * 4          # live f32 intermediates
    vmem_limit = int(min(64 * 1024 * 1024,
                         max(16 * 1024 * 1024,
                             2 * (weight_bytes + tile_bytes + interm_bytes))))

    y_p = pl.pallas_call(
        _mlp_kernel,
        out_shape=jax.ShapeDtypeStruct((batch, out_p), jnp.float32),
        grid=grid,
        in_specs=[
            pl.BlockSpec((tb, in_dim), lambda i: (i, 0)),  # x: tiled over batch, full feature dim
            resident((in_dim, h1_p)),                       # w1
            resident((1, h1_p)),                            # b1
            resident((h1_p, h2_p)),                         # w2
            resident((1, h2_p)),                            # b2
            resident((h2_p, out_p)),                        # w3
            resident((1, out_p)),                           # b3
        ],
        out_specs=pl.BlockSpec((tb, out_p), lambda i: (i, 0)),
        compiler_params=pltpu.CompilerParams(
            dimension_semantics=("parallel",),   # shards batch tiles across TCs on v7x
            vmem_limit_bytes=vmem_limit,
        ),
        cost_estimate=pl.CostEstimate(
            flops=flops,
            transcendentals=transcendentals,
            bytes_accessed=bytes_accessed,
        ),
    )(x, w1, b1, w2, b2, w3, b3)

    # Only the lane padding (out_p -> out_dim) is stripped; consumers can fuse this.
    return y_p[:, :out_dim]


def init_linear_params(key, in_features, out_features, dtype=jnp.float32):
    """Mimics torch.nn.Linear default init: U[-1/sqrt(in), 1/sqrt(in)]."""
    kw, kb = jax.random.split(key)
    bound = 1.0 / (in_features ** 0.5)
    # Stored as (in, out) so the kernel computes x @ W (== torch's x @ W.T).
    w = jax.random.uniform(kw, (in_features, out_features), dtype, -bound, bound)
    b = jax.random.uniform(kb, (1, out_features), dtype, -bound, bound)
    return w, b


if __name__ == "__main__":
    # Module hyperparameters (L1, L2 are constructor args; pick small values).
    IN_DIM, L1, L2, OUT_DIM = 153, 32, 32, 154
    BATCH = 8

    key = jax.random.PRNGKey(0)
    k_x, k1, k2, k3 = jax.random.split(key, 4)

    x = jax.random.normal(k_x, (BATCH, IN_DIM), jnp.float32)
    w1, b1 = init_linear_params(k1, IN_DIM, L1)
    w2, b2 = init_linear_params(k2, L1, L2)
    w3, b3 = init_linear_params(k3, L2, OUT_DIM)

    params = prepare_params(w1, b1, w2, b2, w3, b3)   # one-time pad/cast
    y = mlp_forward(x, params)
    jax.block_until_ready(y)

    # Reference in plain JAX (f32), same math as the PyTorch forward pass.
    ref = jax.nn.sigmoid(x @ w1 + b1)
    ref = jax.nn.sigmoid(ref @ w2 + b2)
    ref = jax.nn.sigmoid(ref @ w3 + b3)

    assert y.shape == (BATCH, OUT_DIM), y.shape
    err = float(jnp.max(jnp.abs(y - ref)))
    # bf16 matmul operands (f32 accumulation, exact tanh-sigmoid) -> loose atol.
    assert err < 2e-2, f"max abs error {err}"

    print("KERNEL_OK")
</pallas_src>

<mosaic_0001>
module attributes {stable_mosaic.version = 11 : i64} {
  func.func @_mlp_kernel(%arg0: i32, %arg1: memref<16x153xf32, #tpu.memory_space<vmem>>, %arg2: memref<153x128xbf16, #tpu.memory_space<vmem>>, %arg3: memref<1x128xf32, #tpu.memory_space<vmem>>, %arg4: memref<128x128xbf16, #tpu.memory_space<vmem>>, %arg5: memref<1x128xf32, #tpu.memory_space<vmem>>, %arg6: memref<128x256xbf16, #tpu.memory_space<vmem>>, %arg7: memref<1x256xf32, #tpu.memory_space<vmem>>, %arg8: memref<16x256xf32, #tpu.memory_space<vmem>>) attributes {dimension_semantics = [#tpu.dimension_semantics<parallel>], iteration_bounds = array<i64: 1>, scalar_prefetch = 0 : i64, scratch_operands = 0 : i64, tpu.core_type = #tpu.core_type<tc>, window_params = [{transform_indices = @transform_0, window_bounds = array<i64: 16, 153>}, {pipeline_mode = #tpu.pipeline_mode<synchronous>, transform_indices = @transform_1, window_bounds = array<i64: 153, 128>}, {pipeline_mode = #tpu.pipeline_mode<synchronous>, transform_indices = @transform_2, window_bounds = array<i64: 1, 128>}, {pipeline_mode = #tpu.pipeline_mode<synchronous>, transform_indices = @transform_3, window_bounds = array<i64: 128, 128>}, {pipeline_mode = #tpu.pipeline_mode<synchronous>, transform_indices = @transform_4, window_bounds = array<i64: 1, 128>}, {pipeline_mode = #tpu.pipeline_mode<synchronous>, transform_indices = @transform_5, window_bounds = array<i64: 128, 256>}, {pipeline_mode = #tpu.pipeline_mode<synchronous>, transform_indices = @transform_6, window_bounds = array<i64: 1, 256>}, {transform_indices = @transform_7, window_bounds = array<i64: 16, 256>}]} {
    %c0 = arith.constant 0 : index
    %c0_0 = arith.constant 0 : index
    %0 = vector.load %arg1[%c0, %c0_0] : memref<16x153xf32, #tpu.memory_space<vmem>>, vector<16x153xf32>
    %1 = arith.truncf %0 : vector<16x153xf32> to vector<16x153xbf16>
    %c0_1 = arith.constant 0 : index
    %c0_2 = arith.constant 0 : index
    %2 = vector.load %arg2[%c0_1, %c0_2] : memref<153x128xbf16, #tpu.memory_space<vmem>>, vector<153x128xbf16>
    %cst = arith.constant dense<0.000000e+00> : vector<16x128xf32>
    %3 = tpu.matmul %1, %2, %cst {dimension_numbers = #tpu.dot_dimension_numbers<[1], [0], [0], [1], [0, 0, 1, 1], [], []>} : vector<16x153xbf16>, vector<153x128xbf16>, vector<16x128xf32> -> vector<16x128xf32>
    %c0_3 = arith.constant 0 : index
    %c0_4 = arith.constant 0 : index
    %4 = vector.load %arg3[%c0_3, %c0_4] : memref<1x128xf32, #tpu.memory_space<vmem>>, vector<1x128xf32>
    %5 = vector.broadcast %4 : vector<1x128xf32> to vector<16x128xf32>
    %6 = arith.addf %3, %5 : vector<16x128xf32>
    %cst_5 = arith.constant 5.000000e-01 : f32
    %7 = vector.broadcast %cst_5 : f32 to vector<16x128xf32>
    %8 = arith.mulf %7, %6 : vector<16x128xf32>
    %9 = math.tanh %8 : vector<16x128xf32>
    %cst_6 = arith.constant 5.000000e-01 : f32
    %10 = vector.broadcast %cst_6 : f32 to vector<16x128xf32>
    %11 = arith.mulf %10, %9 : vector<16x128xf32>
    %cst_7 = arith.constant 5.000000e-01 : f32
    %12 = vector.broadcast %cst_7 : f32 to vector<16x128xf32>
    %13 = arith.addf %11, %12 : vector<16x128xf32>
    %14 = arith.truncf %13 : vector<16x128xf32> to vector<16x128xbf16>
    %c0_8 = arith.constant 0 : index
    %c0_9 = arith.constant 0 : index
    %15 = vector.load %arg4[%c0_8, %c0_9] : memref<128x128xbf16, #tpu.memory_space<vmem>>, vector<128x128xbf16>
    %cst_10 = arith.constant dense<0.000000e+00> : vector<16x128xf32>
    %16 = tpu.matmul %14, %15, %cst_10 {dimension_numbers = #tpu.dot_dimension_numbers<[1], [0], [0], [1], [0, 0, 1, 1], [], []>} : vector<16x128xbf16>, vector<128x128xbf16>, vector<16x128xf32> -> vector<16x128xf32>
    %c0_11 = arith.constant 0 : index
    %c0_12 = arith.constant 0 : index
    %17 = vector.load %arg5[%c0_11, %c0_12] : memref<1x128xf32, #tpu.memory_space<vmem>>, vector<1x128xf32>
    %18 = vector.broadcast %17 : vector<1x128xf32> to vector<16x128xf32>
    %19 = arith.addf %16, %18 : vector<16x128xf32>
    %cst_13 = arith.constant 5.000000e-01 : f32
    %20 = vector.broadcast %cst_13 : f32 to vector<16x128xf32>
    %21 = arith.mulf %20, %19 : vector<16x128xf32>
    %22 = math.tanh %21 : vector<16x128xf32>
    %cst_14 = arith.constant 5.000000e-01 : f32
    %23 = vector.broadcast %cst_14 : f32 to vector<16x128xf32>
    %24 = arith.mulf %23, %22 : vector<16x128xf32>
    %cst_15 = arith.constant 5.000000e-01 : f32
    %25 = vector.broadcast %cst_15 : f32 to vector<16x128xf32>
    %26 = arith.addf %24, %25 : vector<16x128xf32>
    %27 = arith.truncf %26 : vector<16x128xf32> to vector<16x128xbf16>
    %c0_16 = arith.constant 0 : index
    %c0_17 = arith.constant 0 : index
    %28 = vector.load %arg6[%c0_16, %c0_17] : memref<128x256xbf16, #tpu.memory_space<vmem>>, vector<128x256xbf16>
    %cst_18 = arith.constant dense<0.000000e+00> : vector<16x256xf32>
    %29 = tpu.matmul %27, %28, %cst_18 {dimension_numbers = #tpu.dot_dimension_numbers<[1], [0], [0], [1], [0, 0, 1, 1], [], []>} : vector<16x128xbf16>, vector<128x256xbf16>, vector<16x256xf32> -> vector<16x256xf32>
    %c0_19 = arith.constant 0 : index
    %c0_20 = arith.constant 0 : index
    %30 = vector.load %arg7[%c0_19, %c0_20] : memref<1x256xf32, #tpu.memory_space<vmem>>, vector<1x256xf32>
    %31 = vector.broadcast %30 : vector<1x256xf32> to vector<16x256xf32>
    %32 = arith.addf %29, %31 : vector<16x256xf32>
    %cst_21 = arith.constant 5.000000e-01 : f32
    %33 = vector.broadcast %cst_21 : f32 to vector<16x256xf32>
    %34 = arith.mulf %33, %32 : vector<16x256xf32>
    %35 = math.tanh %34 : vector<16x256xf32>
    %cst_22 = arith.constant 5.000000e-01 : f32
    %36 = vector.broadcast %cst_22 : f32 to vector<16x256xf32>
    %37 = arith.mulf %36, %35 : vector<16x256xf32>
    %cst_23 = arith.constant 5.000000e-01 : f32
    %38 = vector.broadcast %cst_23 : f32 to vector<16x256xf32>
    %39 = arith.addf %37, %38 : vector<16x256xf32>
    %c0_24 = arith.constant 0 : index
    %c0_25 = arith.constant 0 : index
    %40 = vector.load %arg8[%c0_24, %c0_25] : memref<16x256xf32, #tpu.memory_space<vmem>>, vector<16x256xf32>
    tpu.vector_store %arg8[%c0_24, %c0_25], %39 {strides = array<i32>} : memref<16x256xf32, #tpu.memory_space<vmem>>, vector<16x256xf32>,
    return
  }
  func.func @transform_0(%arg0: i32) -> (i32, i32) {
    %c0_i32 = arith.constant 0 : i32
    %c0_i32_0 = arith.constant 0 : i32
    return %arg0, %c0_i32 : i32, i32
  }
  func.func @transform_1(%arg0: i32) -> (i32, i32) {
    %c0_i32 = arith.constant 0 : i32
    %c0_i32_0 = arith.constant 0 : i32
    %c0_i32_1 = arith.constant 0 : i32
    return %c0_i32, %c0_i32_0 : i32, i32
  }
  func.func @transform_2(%arg0: i32) -> (i32, i32) {
    %c0_i32 = arith.constant 0 : i32
    %c0_i32_0 = arith.constant 0 : i32
    %c0_i32_1 = arith.constant 0 : i32
    return %c0_i32, %c0_i32_0 : i32, i32
  }
  func.func @transform_3(%arg0: i32) -> (i32, i32) {
    %c0_i32 = arith.constant 0 : i32
    %c0_i32_0 = arith.constant 0 : i32
    %c0_i32_1 = arith.constant 0 : i32
    return %c0_i32, %c0_i32_0 : i32, i32
  }
  func.func @transform_4(%arg0: i32) -> (i32, i32) {
    %c0_i32 = arith.constant 0 : i32
    %c0_i32_0 = arith.constant 0 : i32
    %c0_i32_1 = arith.constant 0 : i32
    return %c0_i32, %c0_i32_0 : i32, i32
  }
  func.func @transform_5(%arg0: i32) -> (i32, i32) {
    %c0_i32 = arith.constant 0 : i32
    %c0_i32_0 = arith.constant 0 : i32
    %c0_i32_1 = arith.constant 0 : i32
    return %c0_i32, %c0_i32_0 : i32, i32
  }
  func.func @transform_6(%arg0: i32) -> (i32, i32) {
    %c0_i32 = arith.constant 0 : i32
    %c0_i32_0 = arith.constant 0 : i32
    %c0_i32_1 = arith.constant 0 : i32
    return %c0_i32, %c0_i32_0 : i32, i32
  }
  func.func @transform_7(%arg0: i32) -> (i32, i32) {
    %c0_i32 = arith.constant 0 : i32
    %c0_i32_0 = arith.constant 0 : i32
    return %arg0, %c0_i32 : i32, i32
  }
}

</mosaic_0001>

<bundles_post_ra>
// kernel: tpu_custom_call.1
= control target key start
LH: loop header
LB: loop body
LE: loop exit
PB: predicated region body
PF: predicated region fallthrough
CT: control target
= control target key end

     0   :  { %12 = vsyncpa [#allocation3], 0  ;;  %s967_s0 = inlined_call_operand.hbm [shape: f32[8,153], index: 0, kind: input, shape index: {}]   ;;  %s968_s1 = inlined_call_operand.hbm [shape: bf16[153,128], index: 1, kind: input, shape index: {}]   ;;  %s969_s2 = inlined_call_operand.vmem [shape: f32[1,128], index: 2, kind: input, shape index: {}]   ;;  %s970_s3 = inlined_call_operand.hbm [shape: bf16[128,128], index: 3, kind: input, shape index: {}]   ;;  %s971_s4 = inlined_call_operand.vmem [shape: f32[1,128], index: 4, kind: input, shape index: {}]   ;;  %s972_s5 = inlined_call_operand.hbm [shape: bf16[128,256], index: 5, kind: input, shape index: {}]   ;;  %s973_s6 = inlined_call_operand.vmem [shape: f32[1,256], index: 6, kind: input, shape index: {}]   ;;  %s974_s7 = inlined_call_operand.hbm [shape: f32[8,256], index: 7, kind: output, shape index: {}]  }
   0x1   :  { %13 = vsyncpa [#allocation6], 0 }
   0x2   :  { %14 = vsyncpa [#allocation9], 0 }
   0x3   :  { %15 = vsyncpa [#allocation4], 0 }
   0x4   :  { %20 = vsyncadd [#allocation3], 256  ;;  %s804_s24 = smov [#allocation5]   ;;  %s686_s28 = scalar_lea.hbm %s968_s1, 1280 }
   0x5   :  { %s33_s25 = sshll.u32 %s804_s24, 4  ;;  %p687_p0 = scmp.ne.s32.totalorder %s968_s1, %s686_s28  ;;  %s34_s25 = int_to_ptr.vmem [resolvable:$true] %s33_s25 }
   0x6   :  { %p690_p1 = scmp.lt.u32.totalorder %s686_s28, %s968_s1 }
   0x8   :  { %p692_p2 = pnand %p690_p1, %p687_p0 }
   0xa   :  { %695 = shalt.err (!%p692_p2)
}
   0xb   :  { %s696_s10 = scalar_lea.vmem %s34_s25, 1280  ;;  %p701_p4 = scmp.lt.s32.totalorder %s34_s25, %s34_s25 }
   0xc   :  { %p697_p3 = scmp.ne.s32.totalorder %s34_s25, %s696_s10  ;;  %p702_p5 = scmp.lt.s32.totalorder %s696_s10, %s696_s10 }
   0xe   :  { %p703_p6 = por %p702_p5, %p701_p4 }
  0x10   :  { %p704_p7 = pnand %p703_p6, %p697_p3 }
  0x12   :  { %707 = shalt.err (!%p704_p7)
}
  0x13   :  { %s805_s11 = smov 64   ;;  %s806_s12 = smov 4  }
  0x14   :  { %39 = dma.hbm_to_vmem [thread:$0]  %s968_s1, 1280, %s34_s25, [#allocation6], %s805_s11, %s805_s11, %s806_s12  }
  0x15   :  { %s807_s15 = smov [#allocation2]   ;;  %s708_s19 = scalar_lea.hbm %s967_s0, 256 }
  0x16   :  { %s21_s16 = sshll.u32 %s807_s15, 4  ;;  %p709_p8 = scmp.ne.s32.totalorder %s967_s0, %s708_s19  ;;  %s22_s16 = int_to_ptr.vmem [resolvable:$true] %s21_s16 }
  0x17   :  { %p712_p9 = scmp.lt.u32.totalorder %s708_s19, %s967_s0 }
  0x19   :  { %p714_p10 = pnand %p712_p9, %p709_p8 }
  0x1b   :  { %717 = shalt.err (!%p714_p10)
}
  0x1c   :  { %s718_s24 = scalar_lea.vmem %s22_s16, 256  ;;  %s722_s1 = scalar_lea.vmem %s22_s16, 512 }
  0x1d   :  { %p719_p11 = scmp.ne.s32.totalorder %s22_s16, %s718_s24  ;;  %p723_p12 = scmp.lt.s32.totalorder %s22_s16, %s22_s16 }
  0x1e   :  { %p724_p13 = scmp.lt.s32.totalorder %s722_s1, %s718_s24 }
  0x20   :  { %p725_p0 = por %p724_p13, %p723_p12 }
  0x22   :  { %p726_p1 = pnand %p725_p0, %p719_p11 }
  0x24   :  { %729 = shalt.err (!%p726_p1)
}
  0x25   :  { %s808_s25 = smov 256   ;;  %s809_s26 = smov 16  }
  0x26   :  { %27 = dma.hbm_to_vmem [thread:$0]  %s967_s0, 256, %s22_s16, [#allocation3], %s808_s25, %s808_s25, %s809_s26  }
  0x27   :  { %s810_s29 = smov [#allocation7]   ;;  %s811_s8 = smov [#allocation8]  }
  0x28   :  { %s47_s30 = sshll.u32 %s810_s29, 4  ;;  %s61_s9 = sshll.u32 %s811_s8, 4  ;;  %s48_s30 = int_to_ptr.vmem [resolvable:$true] %s47_s30  ;;  %s889_s9 = int_to_ptr.vmem [resolvable:$true] %s61_s9 }
  0x29   :  { %s730_s14 = scalar_lea.hbm %s970_s3, 1024 }
  0x2a   :  { %p731_p2 = scmp.ne.s32.totalorder %s970_s3, %s730_s14  ;;  %p734_p3 = scmp.lt.u32.totalorder %s730_s14, %s970_s3 }
  0x2c   :  { %p736_p4 = pnand %p734_p3, %p731_p2 }
  0x2e   :  { %739 = shalt.err (!%p736_p4)
}
  0x2f   :  { %s740_s0 = scalar_lea.vmem %s48_s30, 1024  ;;  %p745_p6 = scmp.lt.s32.totalorder %s48_s30, %s48_s30 }
  0x30   :  { %p741_p5 = scmp.ne.s32.totalorder %s48_s30, %s740_s0  ;;  %p746_p7 = scmp.lt.s32.totalorder %s740_s0, %s740_s0 }
  0x32   :  { %p747_p8 = por %p746_p7, %p745_p6 }
  0x34   :  { %p748_p9 = pnand %p747_p8, %p741_p5 }
  0x36   :  { %751 = shalt.err (!%p748_p9)
}
  0x37   :  { %53 = dma.hbm_to_vmem [thread:$0]  %s970_s3, 1024, %s48_s30, [#allocation6], %s805_s11, %s805_s11, %s806_s12  }
  0x38   :  { %s752_s23 = scalar_lea.hbm %s972_s5, 2048 }
  0x39   :  { %p753_p10 = scmp.ne.s32.totalorder %s972_s5, %s752_s23  ;;  %p756_p11 = scmp.lt.u32.totalorder %s752_s23, %s972_s5 }
  0x3b   :  { %p758_p12 = pnand %p756_p11, %p753_p10 }
  0x3d   :  { %761 = shalt.err (!%p758_p12)
}
  0x3e   :  { %s762_s29 = scalar_lea.vmem %s889_s9, 2048  ;;  %p767_p0 = scmp.lt.s32.totalorder %s889_s9, %s889_s9 }
  0x3f   :  { %p763_p13 = scmp.ne.s32.totalorder %s889_s9, %s762_s29  ;;  %p768_p1 = scmp.lt.s32.totalorder %s762_s29, %s762_s29 }
  0x41   :  { %p769_p2 = por %p768_p1, %p767_p0 }
  0x43   :  { %p770_p3 = pnand %p769_p2, %p763_p13 }
  0x45   :  { %773 = shalt.err (!%p770_p3)
}
  0x46   :  { %s812_s3 = smov 128   ;;  %s813_s11 = smov 8  }
  0x47   :  { %67 = dma.hbm_to_vmem [thread:$0]  %s972_s5, 2048, %s889_s9, [#allocation9], %s812_s3, %s812_s3, %s813_s11  }
  0x48   :  { %796 = dma.done.wait [#allocation3], 512  }
  0x49   :  { %797 = vsyncadd [#allocation3], 4294966784 }
  0x4a   :  { %798 = dma.done.wait [#allocation6], 2304  }
  0x4b   :  { %799 = vsyncadd [#allocation6], 4294964992 }
  0x4c   :  { %800 = dma.done.wait [#allocation9], 2048  }
  0x4d   :  { %801 = vsyncadd [#allocation9], 4294965248  ;;  %v814_v0 = vmov 0   ;;  %v815_v1 = vmov 0.0   ;;  %v628_v2 = vld [vmem:[#allocation5] sm:$0xff]   ;;  %v629_v3 = vld [vmem:[#allocation5 + $0x8] sm:$0xff]  }
  0x4e   :  { %186 = vmatprep.subr.bf16.mxu0 %v814_v0  ;;  %593 = vmatprep.subr.bf16.mxu1 %v815_v1  ;;  %v630_v4 = vld [vmem:[#allocation5 + $0x10] sm:$0xff]   ;;  %v631_v5 = vld [vmem:[#allocation5 + $0x18] sm:$0xff]   ;;  %v84_v6 = vld [vmem:[#allocation2 + $0x8] sm:$0xff]  ;;  %vm175_vm0 = vcmask 203776   ;;  %vm179_vm1 = vcmask 1043456   ;;  %vm180_vm2 = vcmask 1044480  }
  0x4f   :  { %187 = vmatpush1.bf16.msra.mxu0 %v628_v2  ;;  %v86_v7 = vld [vmem:[#allocation2 + $0x18] sm:$0xff]  ;;  %v638_v9 = vld [vmem:[#allocation7] sm:$0xff]   ;;  %v632_v10 = vld [vmem:[#allocation5 + $0x20] sm:$0xff]   ;;  %v816_v15 = vmov 65535   ;;  %vm817_vm3 = vmmov 0  }
  0x50   :  { %188 = vmatprep.subr.bf16.mxu0 %v814_v0  ;;  %v88_v8 = vpack.c.bf16 %v86_v7, %v84_v6  ;;  %v639_v11 = vld [vmem:[#allocation7 + $0x8] sm:$0xff]   ;;  %594 = vmatpush3.bf16.msra.mxu1 %v638_v9  ;;  %v633_v12 = vld [vmem:[#allocation5 + $0x28] sm:$0xff]   ;;  %v634_v13 = vld [vmem:[#allocation5 + $0x30] sm:$0xff]   ;;  %v181_v16 = vsel %vm179_vm1, 4294967295, %v816_v15 }
  0x51   :  { %595 = vmatprep.subr.bf16.mxu1 %v815_v1  ;;  %v635_v14 = vld [vmem:[#allocation5 + $0x38] sm:$0xff]   ;;  %v636_v17 = vld [vmem:[#allocation5 + $0x40] sm:$0xff]   ;;  %v637_v18 = vld [vmem:[#allocation5 + $0x48] sm:$0x1f]   ;;  %v182_v19 = vsel %vm180_vm2, %v181_v16, 0  ;;  %609 = vmatprep.mubr.msk.bf16.mxu1 %vm817_vm3, %v815_v1 }
  0x52   :  { %558 = vmatprep.mubr.msk.bf16.mxu0 %vm175_vm0, %v88_v8  ;;  %v184_v20 = vand.u32 %v637_v18, %v182_v19  ;;  %v83_v21 = vld [vmem:[#allocation2] sm:$0xff]  ;;  %v85_v22 = vld [vmem:[#allocation2 + $0x10] sm:$0xff]  ;;  %v641_v25 = vld [vmem:[#allocation7 + $0x18] sm:$0xff]  }
  0x53   :  { %189 = vmatpush1.bf16.msra.mxu0 %v629_v3  ;;  %v87_v23 = vpack.c.bf16 %v85_v22, %v83_v21  ;;  %v640_v24 = vld [vmem:[#allocation7 + $0x10] sm:$0xff]   ;;  %v642_v26 = vld [vmem:[#allocation7 + $0x20] sm:$0xff]   ;;  %v643_v27 = vld [vmem:[#allocation7 + $0x28] sm:$0xff]  }
  0x54   :  { %190 = vmatprep.subr.bf16.mxu0 %v814_v0  ;;  %596 = vmatpush3.bf16.msra.mxu1 %v639_v11  ;;  %v644_v28 = vld [vmem:[#allocation7 + $0x30] sm:$0xff]   ;;  %v645_v29 = vld [vmem:[#allocation7 + $0x38] sm:$0xff]   ;;  %v648_v30 = vld [vmem:[#allocation8 + $0x4] ss:$8 sps:$4 sm:$0xff]  }
  0x55   :  { %597 = vmatprep.subr.bf16.mxu1 %v815_v1  ;;  %v547_v31 = vld [vmem:[%s969_s2] ss:$0 sm:$0xff]  ;;  %v646_v46 = vld [vmem:[#allocation8] ss:$8 sps:$4 sm:$0xff]   ;;  %v651_v48 = vld [vmem:[#allocation8 + $0x14] ss:$8 sps:$4 sm:$0xff]  }
  0x56   :  { %v649_v49 = vld [vmem:[#allocation8 + $0x10] ss:$8 sps:$4 sm:$0xff]   ;;  %v654_v50 = vld [vmem:[#allocation8 + $0x24] ss:$8 sps:$4 sm:$0xff]   ;;  %v652_v51 = vld [vmem:[#allocation8 + $0x20] ss:$8 sps:$4 sm:$0xff]  }
  0x57   :  { %191 = vmatpush1.bf16.msra.mxu0 %v630_v4  ;;  %v657_v52 = vld [vmem:[#allocation8 + $0x34] ss:$8 sps:$4 sm:$0xff]   ;;  %v655_v53 = vld [vmem:[#allocation8 + $0x30] ss:$8 sps:$4 sm:$0xff]   ;;  %v660_v54 = vld [vmem:[#allocation8 + $0x44] ss:$8 sps:$4 sm:$0xff]  }
  0x58   :  { %192 = vmatprep.subr.bf16.mxu0 %v814_v0  ;;  %598 = vmatpush3.bf16.msra.mxu1 %v640_v24  ;;  %v658_v55 = vld [vmem:[#allocation8 + $0x40] ss:$8 sps:$4 sm:$0xff]   ;;  %v663_v56 = vld [vmem:[#allocation8 + $0x54] ss:$8 sps:$4 sm:$0xff]   ;;  %v661_v57 = vld [vmem:[#allocation8 + $0x50] ss:$8 sps:$4 sm:$0xff]  }
  0x59   :  { %599 = vmatprep.subr.bf16.mxu1 %v815_v1  ;;  %v666_v58 = vld [vmem:[#allocation8 + $0x64] ss:$8 sps:$4 sm:$0xff]   ;;  %v664_v59 = vld [vmem:[#allocation8 + $0x60] ss:$8 sps:$4 sm:$0xff]   ;;  %v669_v60 = vld [vmem:[#allocation8 + $0x74] ss:$8 sps:$4 sm:$0xff]  }
  0x5a   :  { %v667_v61 = vld [vmem:[#allocation8 + $0x70] ss:$8 sps:$4 sm:$0xff]  }
  0x5b   :  { %193 = vmatpush1.bf16.msra.mxu0 %v631_v5  ;;  %v559_v62 = vld [vmem:[%s971_s4] ss:$0 sm:$0xff] }
  0x5c   :  { %194 = vmatprep.subr.bf16.mxu0 %v814_v0  ;;  %600 = vmatpush3.bf16.msra.mxu1 %v641_v25 }
  0x5d   :  { %601 = vmatprep.subr.bf16.mxu1 %v815_v1 }
  0x5f   :  { %195 = vmatpush1.bf16.msra.mxu0 %v632_v10 }
  0x60   :  { %196 = vmatprep.subr.bf16.mxu0 %v814_v0  ;;  %602 = vmatpush3.bf16.msra.mxu1 %v642_v26 }
  0x61   :  { %603 = vmatprep.subr.bf16.mxu1 %v815_v1 }
  0x63   :  { %197 = vmatpush1.bf16.msra.mxu0 %v633_v12 }
  0x64   :  { %198 = vmatprep.subr.bf16.mxu0 %v814_v0  ;;  %604 = vmatpush3.bf16.msra.mxu1 %v643_v27 }
  0x65   :  { %605 = vmatprep.subr.bf16.mxu1 %v815_v1 }
  0x67   :  { %199 = vmatpush1.bf16.msra.mxu0 %v634_v13 }
  0x68   :  { %200 = vmatprep.subr.bf16.mxu0 %v814_v0  ;;  %606 = vmatpush3.bf16.msra.mxu1 %v644_v28 }
  0x69   :  { %607 = vmatprep.subr.bf16.mxu1 %v815_v1 }
  0x6b   :  { %201 = vmatpush1.bf16.msra.mxu0 %v635_v14  ;;  %v375_v14 = vlaneseq }
  0x6c   :  { %202 = vmatprep.subr.bf16.mxu0 %v814_v0  ;;  %608 = vmatpush3.bf16.msra.mxu1 %v645_v29 }
  0x6d   :  { %465 = vmatprep.subr.bf16.mxu1 %v648_v30  ;;  %v376_v15 = vshrl.u32 %v375_v14, 7 }
  0x6f   :  { %203 = vmatpush1.bf16.msra.mxu0 %v636_v17  ;;  %v377_v16 = vsub.s32 0, %v376_v15  ;;  %v373_v17 = vld [vmem:[%s973_s6] sm:$0x3]  ;;  %v381_v18 = vsub.s32 1, %v376_v15 }
  0x70   :  { %204 = vmatprep.subr.bf16.mxu0 %v814_v0 }
  0x71   :  { %v378_v19 = vrot.slane %v373_v17, %v377_v16 }
  0x73   :  { %205 = vmatpush1.bf16.msra.mxu0 %v184_v20  ;;  %v382_v20 = vrot.slane %v373_v17, %v381_v18 }
  0x76   :  { %219 = vmatmul.mubr.bf16.vlgmr.msra.gmra.mrb[0].mxu0 %v87_v23 }
 0x149   :  { %v220_v32 = vpop.f32.mrb[0].mxu0 }
 0x14a   :  { %v221_v33 = vadd.f32 %v547_v31, %v220_v32  ;;  %v222_v34 = vpop.f32.mrb[1].mxu0 }
 0x14b   :  { %v223_v35 = vpop.f32.mrb[2].mxu0 }
 0x14c   :  { %v227_v36 = vmul.f32 0.5, %v221_v33  ;;  %v224_v37 = vadd.f32 %v547_v31, %v223_v35  ;;  %v225_v38 = vpop.f32.mrb[3].mxu0 }
 0x14e   :  { %670 = vtanh.f32 %v227_v36  ;;  %v228_v39 = vmul.f32 0.5, %v224_v37 }
 0x150   :  { %672 = vtanh.f32 %v228_v39 }
 0x158   :  { %v671_v40 = vpop.eup %670 }
 0x159   :  { %v231_v41 = vmul.f32 0.5, %v671_v40 }
 0x15a   :  { %v673_v42 = vpop.eup %672 }
 0x15b   :  { %v232_v43 = vmul.f32 0.5, %v673_v42  ;;  %v233_v44 = vadd.f32 0.5, %v231_v41 }
 0x15d   :  { %v234_v45 = vadd.f32 0.5, %v232_v43 }
 0x15f   :  { %v235_v47 = vpack.c.bf16 %v234_v45, %v233_v44 }
 0x161   :  { %610 = vmatmul.mubr.bf16.vlgmr.msra.gmra.mrb[0].mxu1 %v235_v47 }
 0x162   :  { %466 = vmatpush1.bf16.msra.mxu1 %v646_v46  ;;  %497 = vmatprep.mubr.bf16.mxu1 %v814_v0 }
 0x163   :  { %467 = vmatprep.subr.bf16.mxu1 %v651_v48 }
 0x166   :  { %468 = vmatpush1.bf16.msra.mxu1 %v649_v49 }
 0x167   :  { %469 = vmatprep.subr.bf16.mxu1 %v654_v50 }
 0x16a   :  { %470 = vmatpush1.bf16.msra.mxu1 %v652_v51 }
 0x16b   :  { %471 = vmatprep.subr.bf16.mxu1 %v657_v52 }
 0x16e   :  { %472 = vmatpush1.bf16.msra.mxu1 %v655_v53 }
 0x16f   :  { %473 = vmatprep.subr.bf16.mxu1 %v660_v54 }
 0x172   :  { %474 = vmatpush1.bf16.msra.mxu1 %v658_v55 }
 0x173   :  { %475 = vmatprep.subr.bf16.mxu1 %v663_v56 }
 0x176   :  { %476 = vmatpush1.bf16.msra.mxu1 %v661_v57 }
 0x177   :  { %477 = vmatprep.subr.bf16.mxu1 %v666_v58 }
 0x17a   :  { %478 = vmatpush1.bf16.msra.mxu1 %v664_v59 }
 0x17b   :  { %479 = vmatprep.subr.bf16.mxu1 %v669_v60 }
 0x17e   :  { %480 = vmatpush1.bf16.msra.mxu1 %v667_v61 }
 0x234   :  { %v341_v63 = vpop.f32.mrb[0].mxu1 }
 0x235   :  { %v342_v0 = vadd.f32 %v559_v62, %v341_v63  ;;  %v611_v1 = vpop.f32.mrb[1].mxu1 }
 0x236   :  { %v344_v2 = vpop.f32.mrb[2].mxu1 }
 0x237   :  { %v348_v3 = vmul.f32 0.5, %v342_v0  ;;  %v345_v4 = vadd.f32 %v559_v62, %v344_v2  ;;  %v612_v5 = vpop.f32.mrb[3].mxu1 }
 0x239   :  { %674 = vtanh.f32 %v348_v3  ;;  %v349_v6 = vmul.f32 0.5, %v345_v4 }
 0x23b   :  { %676 = vtanh.f32 %v349_v6 }
 0x243   :  { %v675_v7 = vpop.eup %674 }
 0x244   :  { %v352_v8 = vmul.f32 0.5, %v675_v7 }
 0x245   :  { %v677_v9 = vpop.eup %676 }
 0x246   :  { %v353_v10 = vmul.f32 0.5, %v677_v9  ;;  %v354_v11 = vadd.f32 0.5, %v352_v8 }
 0x248   :  { %v355_v12 = vadd.f32 0.5, %v353_v10 }
 0x24a   :  { %v356_v13 = vpack.c.bf16 %v355_v12, %v354_v11 }
 0x24c   :  { %498 = vmatmul.mubr.bf16.vlgmr.msra.gmra.mrb[4].mxu1 %v356_v13 }
 0x31f   :  { %v499_v21 = vpop.f32.mrb[4].mxu1 }
 0x320   :  { %v500_v22 = vadd.f32 %v499_v21, %v378_v19  ;;  %v501_v23 = vpop.f32.mrb[5].mxu1 }
 0x321   :  { %v502_v24 = vadd.f32 %v501_v23, %v382_v20  ;;  %v503_v25 = vpop.f32.mrb[6].mxu1 }
 0x322   :  { %v508_v26 = vmul.f32 0.5, %v500_v22  ;;  %v504_v27 = vadd.f32 %v503_v25, %v378_v19  ;;  %v505_v28 = vpop.f32.mrb[7].mxu1 }
 0x323   :  { %v509_v29 = vmul.f32 0.5, %v502_v24  ;;  %v506_v30 = vadd.f32 %v505_v28, %v382_v20 }
 0x324   :  { %678 = vtanh.f32 %v508_v26  ;;  %v510_v31 = vmul.f32 0.5, %v504_v27 }
 0x325   :  { %680 = vtanh.f32 %v509_v29  ;;  %v511_v32 = vmul.f32 0.5, %v506_v30 }
 0x326   :  { %682 = vtanh.f32 %v510_v31 }
 0x327   :  { %684 = vtanh.f32 %v511_v32 }
 0x32e   :  { %v679_v33 = vpop.eup %678 }
 0x32f   :  { %v681_v34 = vpop.eup %680  ;;  %v516_v35 = vmul.f32 0.5, %v679_v33 }
 0x330   :  { %v683_v36 = vpop.eup %682  ;;  %v517_v37 = vmul.f32 0.5, %v681_v34 }
 0x331   :  { %v685_v38 = vpop.eup %684  ;;  %v520_v39 = vadd.f32 0.5, %v516_v35  ;;  %v518_v40 = vmul.f32 0.5, %v683_v36 }
 0x332   :  { %v521_v41 = vadd.f32 0.5, %v517_v37  ;;  %v519_v42 = vmul.f32 0.5, %v685_v38 }
 0x333   :  { %524 = vst [vmem:[#allocation10] sm:$0xff] %v520_v39  ;;  %v522_v43 = vadd.f32 0.5, %v518_v40 }
 0x334   :  { %525 = vst [vmem:[#allocation10 + $0x8] sm:$0xff] %v521_v41  ;;  %v523_v44 = vadd.f32 0.5, %v519_v42 }
 0x335   :  { %526 = vst [vmem:[#allocation10 + $0x10] sm:$0xff] %v522_v43 }
 0x336   :  { %527 = vst [vmem:[#allocation10 + $0x18] sm:$0xff] %v523_v44 }
 0x337   :  { %532 = vsyncadd [#allocation4], 256  ;;  %s818_s6 = smov [#allocation10]  }
 0x338   :  { %s533_s13 = sshll.u32 %s818_s6, 4  ;;  %s534_s13 = int_to_ptr.vmem [resolvable:$true] %s533_s13 }
 0x339   :  { %s774_s14 = scalar_lea.vmem %s534_s13, 256  ;;  %s778_s15 = scalar_lea.vmem %s534_s13, 512 }
 0x33a   :  { %p775_p4 = scmp.ne.s32.totalorder %s534_s13, %s774_s14  ;;  %p779_p5 = scmp.lt.s32.totalorder %s534_s13, %s534_s13 }
 0x33b   :  { %p780_p6 = scmp.lt.s32.totalorder %s778_s15, %s774_s14 }
 0x33d   :  { %p781_p7 = por %p780_p6, %p779_p5 }
 0x33f   :  { %p782_p8 = pnand %p781_p7, %p775_p4 }
 0x341   :  { %785 = shalt.err (!%p782_p8)
}
 0x342   :  { %s786_s19 = scalar_lea.hbm %s974_s7, 256 }
 0x343   :  { %p787_p9 = scmp.ne.s32.totalorder %s974_s7, %s786_s19  ;;  %p790_p10 = scmp.lt.u32.totalorder %s786_s19, %s974_s7 }
 0x345   :  { %p792_p11 = pnand %p790_p10, %p787_p9 }
 0x347   :  { %795 = shalt.err (!%p792_p11)
}
 0x348   :  { %539 = dma.vmem_to_hbm [thread:$0]  %s534_s13, 256, %s974_s7, [#allocation4], %s808_s25, %s808_s25, %s809_s26  }
 0x349   :  { %802 = dma.done.wait [#allocation4], 512  }
 0x34a   :  { %803 = vsyncadd [#allocation4], 4294966784 }
 0x34b   :  { %543 = vsyncpa [#allocation3], 1 }
 0x34c   :  { %544 = vsyncpa [#allocation6], 1 }
 0x34d   :  { %545 = vsyncpa [#allocation9], 1 }
 0x34e   :  { %546 = vsyncpa [#allocation4], 1 }

</bundles_post_ra>
